<compile_context>
chip_gen: v5e
topology: v5e:2x2
jax: 0.10.0
libtpu: 0.0.40
codegen_flags: <defaults>
</compile_context>

<pallas_src>
import functools
import math

import jax
import jax.numpy as jnp
from jax.experimental import pallas as pl
from jax.experimental.pallas import tpu as pltpu


def _dpa_kernel(x_ref, wf_ref, aff_ref, w2_ref, b2_ref, o_ref, *, eps):
    """x:(B,d0)  wf:(d0,d2)  aff:(3,d2)=[fused_bias; gamma; beta]
    w2:(d2,Npad)  b2:(1,Npad)  o:(B,Npad)   (Npad = 128 lane-dense output)"""
    f32 = jnp.float32
    x = x_ref[...]

    # Fused affine chain: input_v -> MHA in_proj_v -> MHA out_proj -> net Linear1.
    # (Softmax over the length-1 attention sequence is identically 1, so the
    #  attention output equals the projected values; Q/K paths contribute nothing.)
    h1 = jnp.dot(x, wf_ref[...], preferred_element_type=f32) + aff_ref[0:1, :]

    # BatchNorm1d with batch statistics (biased variance), then ReLU.
    mean = jnp.mean(h1, axis=0, keepdims=True)
    cen = h1 - mean
    var = jnp.mean(cen * cen, axis=0, keepdims=True)
    scale = jax.lax.rsqrt(var + eps) * aff_ref[1:2, :]      # fold gamma into the scale
    h1r = jnp.maximum(cen * scale + aff_ref[2:3, :], 0.0)

    # Final linear, written as one lane-dense (B, 128) store (padded cols are zero).
    o_ref[...] = jnp.dot(h1r, w2_ref[...], preferred_element_type=f32) + b2_ref[...]


def _linear_init(key, in_f, out_f):
    """PyTorch-convention (out,in) weight ~ N(0, 0.01), bias ~ U(-0.1, 0.1)."""
    kw, kb = jax.random.split(key)
    w = 0.01 * jax.random.normal(kw, (out_f, in_f), jnp.float32)
    b = jax.random.uniform(kb, (out_f,), jnp.float32, minval=-0.1, maxval=0.1)
    return w, b


def init_params(key, layer_sizes, num_heads=4):
    # Concrete instantiation: layer_sizes = [d0, d1, d2, d3]
    # => net = [Linear(d1,d2), BatchNorm1d(d2), ReLU, Linear(d2,d3)]
    d0, d1, d2, d3 = layer_sizes
    keys = jax.random.split(key, 8)
    wq, bq = _linear_init(keys[0], d0, d1)
    wk, bk = _linear_init(keys[1], d0, d1)
    wv, bv = _linear_init(keys[2], d0, d1)
    # MHA in_proj (split into q/k/v blocks) and out_proj -- deterministic synthetic init.
    wiq, biq = _linear_init(keys[3], d1, d1)
    wik, bik = _linear_init(keys[4], d1, d1)
    wiv, biv = _linear_init(keys[5], d1, d1)
    wo, bo = _linear_init(keys[6], d1, d1)
    k1, k2 = jax.random.split(keys[7])
    w1, b1 = _linear_init(k1, d1, d2)
    w2, b2 = _linear_init(k2, d2, d3)
    gamma = jnp.ones((d2,), jnp.float32)
    beta = jnp.zeros((d2,), jnp.float32)
    return dict(wq=wq, bq=bq, wk=wk, bk=bk, wv=wv, bv=bv,
                wiq=wiq, biq=biq, wik=wik, bik=bik, wiv=wiv, biv=biv,
                wo=wo, bo=bo, w1=w1, b1=b1, gamma=gamma, beta=beta,
                w2=w2, b2=b2)


def direct_predict_att(x, params, num_heads=4, eps=1e-5, out_pad=128):
    """Forward pass of Direct_Predict_ATT via a single gridless Pallas kernel."""
    x = jnp.asarray(x, jnp.float32)
    B = x.shape[0]
    d2 = params["w1"].shape[0]
    d3 = params["w2"].shape[0]

    # Trace-time fusion of the affine chain up to BatchNorm (exact algebra):
    #   h1 = (((x@Wv^T + bv)@Wiv^T + biv)@Wo^T + bo)@W1^T + b1  =  x @ Wf + bf
    # (Q/K parameters are mathematically dead: softmax over a length-1 seq == 1.)
    wv_t, wiv_t = params["wv"].T, params["wiv"].T
    wo_t, w1_t = params["wo"].T, params["w1"].T
    wf = wv_t @ wiv_t @ wo_t @ w1_t                                    # (d0, d2)
    bf = ((params["bv"] @ wiv_t + params["biv"]) @ wo_t
          + params["bo"]) @ w1_t + params["b1"]                        # (d2,)

    # Pack the three (d2,) per-feature vectors used around BatchNorm into one array.
    aff = jnp.stack([bf, params["gamma"], params["beta"]], axis=0)     # (3, d2)

    # Pad the final projection to a lane-dense 128-wide output (zeros past d3).
    npad = max(out_pad, d3)
    w2p = jnp.zeros((d2, npad), jnp.float32).at[:, :d3].set(params["w2"].T)
    b2p = jnp.zeros((1, npad), jnp.float32).at[0, :d3].set(params["b2"])

    kernel = functools.partial(_dpa_kernel, eps=eps)
    vmem = pl.BlockSpec(memory_space=pltpu.MemorySpace.VMEM)
    out = pl.pallas_call(
        kernel,
        out_shape=jax.ShapeDtypeStruct((B, npad), jnp.float32),
        in_specs=[vmem, vmem, vmem, vmem, vmem],
        out_specs=vmem,
    )(x, wf, aff, w2p, b2p)
    return out[:, :d3]


def reference(x, params, num_heads=4, eps=1e-5):
    """Pure-JAX reference of the original (unfused) forward pass, incl. Q/K/softmax."""
    def lin(h, w, b):
        return h @ w.T + b
    q = lin(x, params["wq"], params["bq"])
    k = lin(x, params["wk"], params["bk"])
    v = lin(x, params["wv"], params["bv"])
    q2 = lin(q, params["wiq"], params["biq"])
    k2 = lin(k, params["wik"], params["bik"])
    v2 = lin(v, params["wiv"], params["biv"])
    E = q2.shape[1]
    hd = E // num_heads
    B = x.shape[0]
    q2 = q2.reshape(B, num_heads, hd) / math.sqrt(hd)
    k2 = k2.reshape(B, num_heads, hd)
    v2 = v2.reshape(B, num_heads, hd)
    s = jnp.sum(q2 * k2, axis=-1, keepdims=True)            # (B, H, 1)
    w = jax.nn.softmax(s[..., None], axis=-1)[..., 0]       # softmax over length-1 seq
    attn = (w * v2).reshape(B, E)
    attn_out = lin(attn, params["wo"], params["bo"])
    h1 = lin(attn_out, params["w1"], params["b1"])
    mean = jnp.mean(h1, axis=0, keepdims=True)
    var = jnp.mean((h1 - mean) ** 2, axis=0, keepdims=True)
    h1 = (h1 - mean) / jnp.sqrt(var + eps) * params["gamma"] + params["beta"]
    h1 = jnp.maximum(h1, 0.0)
    return lin(h1, params["w2"], params["b2"])


if __name__ == "__main__":
    # layer_sizes = [16, 32, 64, 3] (embed_dim=32 divisible by 4 heads), batch=8.
    layer_sizes = [16, 32, 64, 3]
    batch = 8

    root = jax.random.PRNGKey(0)
    kx, kp = jax.random.split(root)
    x = jax.random.normal(kx, (batch, layer_sizes[0]), jnp.float32)
    params = init_params(kp, layer_sizes)

    out = direct_predict_att(x, params)
    out = jax.block_until_ready(out)

    ref = reference(x, params)
    assert out.shape == (batch, layer_sizes[-1]), out.shape
    # Tolerance accounts for fp32 reassociation of the (exact) trace-time weight
    # fusion, which BatchNorm's 1/sqrt(var+eps) amplifies at these tiny variances.
    assert jnp.allclose(out, ref, atol=1e-4, rtol=1e-4), (
        "Pallas kernel does not match JAX reference")

    print("KERNEL_OK")
</pallas_src>

<mosaic_0001>
module attributes {stable_mosaic.version = 11 : i64} {
  func.func @_dpa_kernel(%arg0: memref<8x16xf32, #tpu.memory_space<vmem>>, %arg1: memref<16x64xf32, #tpu.memory_space<vmem>>, %arg2: memref<3x64xf32, #tpu.memory_space<vmem>>, %arg3: memref<64x128xf32, #tpu.memory_space<vmem>>, %arg4: memref<1x128xf32, #tpu.memory_space<vmem>>, %arg5: memref<8x128xf32, #tpu.memory_space<vmem>>) attributes {dimension_semantics = [], scalar_prefetch = 0 : i64, scratch_operands = 0 : i64, tpu.core_type = #tpu.core_type<tc>} {
    %c0 = arith.constant 0 : index
    %c0_0 = arith.constant 0 : index
    %0 = vector.load %arg0[%c0, %c0_0] : memref<8x16xf32, #tpu.memory_space<vmem>>, vector<8x16xf32>
    %c0_1 = arith.constant 0 : index
    %c0_2 = arith.constant 0 : index
    %1 = vector.load %arg1[%c0_1, %c0_2] : memref<16x64xf32, #tpu.memory_space<vmem>>, vector<16x64xf32>
    %cst = arith.constant dense<0.000000e+00> : vector<8x64xf32>
    %2 = tpu.matmul %0, %1, %cst {dimension_numbers = #tpu.dot_dimension_numbers<[1], [0], [0], [1], [0, 0, 1, 1], [], []>} : vector<8x16xf32>, vector<16x64xf32>, vector<8x64xf32> -> vector<8x64xf32>
    %c0_3 = arith.constant 0 : index
    %c0_4 = arith.constant 0 : index
    %3 = vector.load %arg2[%c0_3, %c0_4] : memref<3x64xf32, #tpu.memory_space<vmem>>, vector<1x64xf32>
    %4 = vector.broadcast %3 : vector<1x64xf32> to vector<8x64xf32>
    %5 = arith.addf %2, %4 : vector<8x64xf32>
    %cst_5 = arith.constant dense<0.000000e+00> : vector<64xf32>
    %6 = vector.multi_reduction <add>, %5, %cst_5 [0] : vector<8x64xf32> to vector<64xf32>
    %7 = vector.shape_cast %6 : vector<64xf32> to vector<1x64xf32>
    %cst_6 = arith.constant 8.000000e+00 : f32
    %8 = vector.broadcast %cst_6 : f32 to vector<1x64xf32>
    %9 = arith.divf %7, %8 : vector<1x64xf32>
    %10 = vector.broadcast %9 : vector<1x64xf32> to vector<8x64xf32>
    %11 = arith.subf %5, %10 : vector<8x64xf32>
    %12 = arith.mulf %11, %11 : vector<8x64xf32>
    %cst_7 = arith.constant dense<0.000000e+00> : vector<64xf32>
    %13 = vector.multi_reduction <add>, %12, %cst_7 [0] : vector<8x64xf32> to vector<64xf32>
    %14 = vector.shape_cast %13 : vector<64xf32> to vector<1x64xf32>
    %cst_8 = arith.constant 8.000000e+00 : f32
    %15 = vector.broadcast %cst_8 : f32 to vector<1x64xf32>
    %16 = arith.divf %14, %15 : vector<1x64xf32>
    %cst_9 = arith.constant 9.99999974E-6 : f32
    %17 = vector.broadcast %cst_9 : f32 to vector<1x64xf32>
    %18 = arith.addf %16, %17 : vector<1x64xf32>
    %19 = math.rsqrt %18 : vector<1x64xf32>
    %c1 = arith.constant 1 : index
    %c0_10 = arith.constant 0 : index
    %20 = vector.load %arg2[%c1, %c0_10] : memref<3x64xf32, #tpu.memory_space<vmem>>, vector<1x64xf32>
    %21 = arith.mulf %19, %20 : vector<1x64xf32>
    %22 = vector.broadcast %21 : vector<1x64xf32> to vector<8x64xf32>
    %23 = arith.mulf %11, %22 : vector<8x64xf32>
    %c2 = arith.constant 2 : index
    %c0_11 = arith.constant 0 : index
    %24 = vector.load %arg2[%c2, %c0_11] : memref<3x64xf32, #tpu.memory_space<vmem>>, vector<1x64xf32>
    %25 = vector.broadcast %24 : vector<1x64xf32> to vector<8x64xf32>
    %26 = arith.addf %23, %25 : vector<8x64xf32>
    %cst_12 = arith.constant 0.000000e+00 : f32
    %27 = vector.broadcast %cst_12 : f32 to vector<8x64xf32>
    %28 = arith.maximumf %26, %27 : vector<8x64xf32>
    %c0_13 = arith.constant 0 : index
    %c0_14 = arith.constant 0 : index
    %29 = vector.load %arg3[%c0_13, %c0_14] : memref<64x128xf32, #tpu.memory_space<vmem>>, vector<64x128xf32>
    %cst_15 = arith.constant dense<0.000000e+00> : vector<8x128xf32>
    %30 = tpu.matmul %28, %29, %cst_15 {dimension_numbers = #tpu.dot_dimension_numbers<[1], [0], [0], [1], [0, 0, 1, 1], [], []>} : vector<8x64xf32>, vector<64x128xf32>, vector<8x128xf32> -> vector<8x128xf32>
    %c0_16 = arith.constant 0 : index
    %c0_17 = arith.constant 0 : index
    %31 = vector.load %arg4[%c0_16, %c0_17] : memref<1x128xf32, #tpu.memory_space<vmem>>, vector<1x128xf32>
    %32 = vector.broadcast %31 : vector<1x128xf32> to vector<8x128xf32>
    %33 = arith.addf %30, %32 : vector<8x128xf32>
    %c0_18 = arith.constant 0 : index
    %c0_19 = arith.constant 0 : index
    %34 = vector.load %arg5[%c0_18, %c0_19] : memref<8x128xf32, #tpu.memory_space<vmem>>, vector<8x128xf32>
    tpu.vector_store %arg5[%c0_18, %c0_19], %33 {strides = array<i32>} : memref<8x128xf32, #tpu.memory_space<vmem>>, vector<8x128xf32>,
    return
  }
}

</mosaic_0001>

<bundles_post_ra>
// kernel: tpu_custom_call.1
= control target key start
LH: loop header
LB: loop body
LE: loop exit
PB: predicated region body
PF: predicated region fallthrough
CT: control target
= control target key end

     0   :  { %10 = vsyncpa [#allocation3], 0  ;;  %s413_s0 = inlined_call_operand.hbm [shape: f32[8,16], index: 0, kind: input, shape index: {}]   ;;  %s414_s1 = inlined_call_operand.hbm [shape: f32[16,64], index: 1, kind: input, shape index: {}]   ;;  %s415_s2 = inlined_call_operand.hbm [shape: f32[3,64], index: 2, kind: input, shape index: {}]   ;;  %s416_s3 = inlined_call_operand.hbm [shape: f32[64,128], index: 3, kind: input, shape index: {}]   ;;  %s417_s4 = inlined_call_operand.vmem [shape: f32[1,128], index: 4, kind: input, shape index: {}]   ;;  %s418_s5 = inlined_call_operand.hbm [shape: f32[8,128], index: 5, kind: output, shape index: {}]  }
   0x1   :  { %11 = vsyncpa [#allocation6], 0 }
   0x2   :  { %12 = vsyncpa [#allocation9], 0  ;;  %s29_s20 = sshll.u32 %s414_s1, 4  ;;  %s30_s20 = int_to_ptr.hbm [resolvable:$true] %s29_s20 }
   0x3   :  { %13 = vsyncpa [#allocation4], 0  ;;  %s354_s21 = smov [#allocation5]   ;;  %s19_s25 = sshll.u32 %s413_s0, 4  ;;  %s20_s25 = int_to_ptr.hbm [resolvable:$true] %s19_s25 }
   0x4   :  { %s31_s22 = sshll.u32 %s354_s21, 4  ;;  %s355_s26 = smov 128   ;;  %s32_s22 = int_to_ptr.vmem [resolvable:$true] %s31_s22 }
   0x5   :  { %s356_s27 = smov 8   ;;  %s357_s28 = smov [#allocation2]  }
   0x6   :  { %37 = dma.hbm_to_vmem [thread:$0]  %s30_s20, 256, %s32_s22, [#allocation6], %s355_s26, %s355_s26, %s356_s27  }
   0x7   :  { %s21_s29 = sshll.u32 %s357_s28, 4  ;;  %s43_s7 = sshll.u32 %s415_s2, 4  ;;  %s22_s29 = int_to_ptr.vmem [resolvable:$true] %s21_s29  ;;  %s44_s7 = int_to_ptr.hbm [resolvable:$true] %s43_s7 }
   0x8   :  { %24 = dma.hbm_to_vmem [thread:$0]  %s20_s25, 128, %s22_s29, [#allocation3]  }
   0x9   :  { %s53_s9 = sshll.u32 %s416_s3, 4  ;;  %s358_s10 = smov [#allocation7]   ;;  %s54_s9 = int_to_ptr.hbm [resolvable:$true] %s53_s9 }
   0xa   :  { %s45_s11 = sshll.u32 %s358_s10, 4  ;;  %s359_s0 = smov [#allocation8]   ;;  %s46_s11 = int_to_ptr.vmem [resolvable:$true] %s45_s11 }
   0xb   :  { %48 = dma.hbm_to_vmem [thread:$0]  %s44_s7, 64, %s46_s11, [#allocation6]  }
   0xc   :  { %s55_s12 = sshll.u32 %s359_s0, 4  ;;  %s56_s12 = int_to_ptr.vmem [resolvable:$true] %s55_s12 }
   0xd   :  { %61 = dma.hbm_to_vmem [thread:$0]  %s54_s9, 1024, %s56_s12, [#allocation9], %s355_s26, %s355_s26, %s356_s27  }
   0xe   :  { %346 = dma.done.wait [#allocation3], 128  }
   0xf   :  { %347 = vsyncadd [#allocation3], 4294967168 }
  0x10   :  { %348 = dma.done.wait [#allocation6], 320  }
  0x11   :  { %349 = vsyncadd [#allocation6], 4294966976 }
  0x12   :  { %350 = dma.done.wait [#allocation9], 1024  }
  0x13   :  { %351 = vsyncadd [#allocation9], 4294966272  ;;  %v82_v0 = vld [vmem:[#allocation5 + $0x8] sm:$0xff]  ;;  %v81_v1 = vld [vmem:[#allocation5] sm:$0xff]  ;;  %vm85_vm0 = vcmask 130048   ;;  %v360_v11 = vmov 8.0  }
  0x14   :  { %103 = vmatpush.msra.mxu0 %v82_v0  ;;  %v80_v2 = vld [vmem:[#allocation2] sm:$0xff]  ;;  %v161_v3 = vld [vmem:[#allocation8 + $0x38] sm:$0xff]  ;;  %v160_v4 = vld [vmem:[#allocation8 + $0x30] sm:$0xff]  ;;  %222 = vrcp.f32 %v360_v11  ;;  %vm109_vm1 = vcmask 523264   ;;  %s361_s13 = smov [#allocation10]   ;;  %s197_s17 = sshll.u32 %s418_s5, 4  ;;  %s198_s17 = int_to_ptr.hbm [resolvable:$true] %s197_s17 }
  0x15   :  { %177 = vmatpush.msra.mxu1 %v161_v3  ;;  %v159_v5 = vld [vmem:[#allocation8 + $0x28] sm:$0xff]  ;;  %v158_v6 = vld [vmem:[#allocation8 + $0x20] sm:$0xff]  ;;  %v157_v7 = vld [vmem:[#allocation8 + $0x18] sm:$0xff]  ;;  %s195_s14 = sshll.u32 %s361_s13, 4  ;;  %s196_s14 = int_to_ptr.vmem [resolvable:$true] %s195_s14 }
  0x16   :  { %104 = vmatpush.msra.mxu0 %v81_v1  ;;  %v156_v8 = vld [vmem:[#allocation8 + $0x10] sm:$0xff]  ;;  %v155_v9 = vld [vmem:[#allocation8 + $0x8] sm:$0xff]  ;;  %v154_v10 = vld [vmem:[#allocation8] sm:$0xff] }
  0x17   :  { %209 = vmatmul.msk.f32.vlgmr.msra.gmra.mxu0 %vm85_vm0, %v80_v2  ;;  %178 = vmatpush.msra.mxu1 %v160_v4  ;;  %v219_v13 = vld [vmem:[#allocation7] ss:$0 sm:$0xff]  ;;  %v146_v46 = vld [vmem:[#allocation7 + $0x1] sm:$0x1]  ;;  %v220_v50 = vld [vmem:[#allocation7 + $0x2] ss:$0 sm:$0xff] }
  0x18   :  { %v221_v54 = vld [vmem:[%s417_s4] ss:$0 sm:$0xff] }
  0x19   :  { %179 = vmatpush.msra.mxu1 %v159_v5 }
  0x1a   :  { %v223_v12 = vpop.eup %222 }
  0x1b   :  { %180 = vmatpush.msra.mxu1 %v158_v6  ;;  %v118_v14 = vmul.f32 8.0, %v223_v12  ;;  %vm122_vm2 = vweird.f32 %v223_v12 }
  0x1d   :  { %181 = vmatpush.msra.mxu1 %v157_v7  ;;  %v119_v17 = vsub.f32 1.0, %v118_v14 }
  0x1f   :  { %182 = vmatpush.msra.mxu1 %v156_v8  ;;  %v120_v20 = vmul.f32 %v223_v12, %v119_v17 }
  0x21   :  { %183 = vmatpush.msra.mxu1 %v155_v9  ;;  %v121_v23 = vadd.f32 %v223_v12, %v120_v20 }
  0x23   :  { %184 = vmatpush.msra.mxu1 %v154_v10  ;;  %v123_v26 = vsel %vm122_vm2, %v223_v12, %v121_v23 }
  0x94   :  { %v106_v15 = vpop.f32.mrf.mxu0 }
  0x95   :  { %v107_v16 = vadd.f32 %v219_v13, %v106_v15 }
  0x97   :  { %v110_v18 = vsel %vm109_vm1, %v107_v16, 0.0 }
  0x98   :  { %v111_v19 = vrot.slane %v110_v18, 4 }
  0x9a   :  { %v112_v21 = vadd.f32 %v111_v19, %v110_v18 }
  0x9c   :  { %v113_v22 = vrot.slane %v112_v21, 2 }
  0x9e   :  { %v114_v24 = vadd.f32 %v113_v22, %v112_v21 }
  0xa0   :  { %v115_v25 = vrot.slane %v114_v24, 1 }
  0xa2   :  { %v116_v27 = vadd.f32 %v115_v25, %v114_v24 }
  0xa4   :  { %v124_v28 = vmul.f32 %v123_v26, %v116_v27 }
  0xa6   :  { %v125_v29 = vsub.f32 %v107_v16, %v124_v28 }
  0xa8   :  { %v126_v30 = vmul.f32 %v125_v29, %v125_v29 }
  0xaa   :  { %v127_v31 = vsel %vm109_vm1, %v126_v30, 0.0 }
  0xab   :  { %v128_v32 = vrot.slane %v127_v31, 4 }
  0xad   :  { %v129_v33 = vadd.f32 %v128_v32, %v127_v31 }
  0xaf   :  { %v130_v34 = vrot.slane %v129_v33, 2 }
  0xb1   :  { %v131_v35 = vadd.f32 %v130_v34, %v129_v33 }
  0xb3   :  { %v132_v36 = vrot.slane %v131_v35, 1 }
  0xb5   :  { %v133_v37 = vadd.f32 %v132_v36, %v131_v35 }
  0xb7   :  { %v134_v38 = vmul.f32 %v133_v37, %v123_v26 }
  0xb9   :  { %v135_v39 = vadd.f32 1e-05, %v134_v38 }
  0xbb   :  { %224 = vrsqrt.f32 %v135_v39  ;;  %vm142_vm4 = vweird.f32 %v135_v39 }
  0xc1   :  { %v225_v40 = vpop.eup %224 }
  0xc2   :  { %v137_v41 = vmul.f32 %v225_v40, %v135_v39  ;;  %vm143_vm3 = vweird.f32 %v225_v40 }
  0xc3   :  { %vm144_vm5 = vmor %vm142_vm4, %vm143_vm3 }
  0xc4   :  { %v138_v42 = vmul.f32 %v225_v40, %v137_v41 }
  0xc6   :  { %v139_v43 = vmul.f32 0.5, %v138_v42 }
  0xc8   :  { %v140_v44 = vsub.f32 1.5, %v139_v43 }
  0xca   :  { %v141_v45 = vmul.f32 %v225_v40, %v140_v44 }
  0xcc   :  { %v145_v47 = vsel %vm144_vm5, %v225_v40, %v141_v45 }
  0xcd   :  { %v147_v48 = vmul.f32 %v146_v46, %v145_v47 }
  0xcf   :  { %v148_v49 = vperm.slane %v147_v48, 0 }
  0xd1   :  { %v149_v51 = vmul.f32 %v148_v49, %v125_v29 }
  0xd3   :  { %v152_v52 = vadd.f32 %v220_v50, %v149_v51 }
  0xd5   :  { %v153_v53 = vmax.f32 %v152_v52, 0.0 }
  0xd7   :  { %210 = vmatmul.msk.f32.vlgmr.msra.gmra.mxu1 %vm109_vm1, %v153_v53 }
 0x154   :  { %v186_v55 = vpop.f32.mrf.mxu1 }
 0x155   :  { %v187_v56 = vadd.f32 %v221_v54, %v186_v55 }
 0x157   :  { %189 = vst [vmem:[#allocation10] sm:$0xff] %v187_v56 }
 0x158   :  { %200 = dma.vmem_to_hbm [thread:$0]  %s196_s14, 128, %s198_s17, [#allocation4]  }
 0x159   :  { %352 = dma.done.wait [#allocation4], 128  }
 0x15a   :  { %353 = vsyncadd [#allocation4], 4294967168 }
 0x15b   :  { %205 = vsyncpa [#allocation3], 1 }
 0x15c   :  { %206 = vsyncpa [#allocation6], 1 }
 0x15d   :  { %207 = vsyncpa [#allocation9], 1 }
 0x15e   :  { %208 = vsyncpa [#allocation4], 1 }

</bundles_post_ra>
